<compile_context>
chip_gen: v6e
topology: v6e:2x2x1
jax: 0.10.0
libtpu: 0.0.40
codegen_flags: <defaults>
</compile_context>

<pallas_src>
import jax
import jax.numpy as jnp
from jax.experimental import pallas as pl
from jax.experimental.pallas import tpu as pltpu

OBS_DIM = 5
ACT_DIM = 1
IN_DIM = OBS_DIM + ACT_DIM        # 6
HALF = 64                         # hidden_layers[0] / 2
HIDDEN = 128                      # Q_structure = [128, 128, 128]
DEFAULT_TILE_B = 512


def _round_up(x, m):
    return ((x + m - 1) // m) * m


def _q_kernel(x_ref, win_ref, bin_ref,
              w1_ref, b1_ref, w2_ref, b2_ref,
              w3_ref, b3_ref, out_ref):
    f32 = jnp.float32
    x = x_ref[...]                                                    # (TB, 6)

    # Input layer: block-diagonal fusion of (Lobs | Lact) + concat, then ReLU.
    xcat = jnp.dot(x, win_ref[...], preferred_element_type=f32) + bin_ref[...]
    xcat = jnp.maximum(xcat, 0.0)                                     # (TB, 128)

    # Hidden layer 1
    h1 = jnp.dot(xcat, w1_ref[...], preferred_element_type=f32) + b1_ref[...]
    h1 = jnp.maximum(h1, 0.0)                                         # (TB, 128)

    # Hidden layer 2
    h2 = jnp.dot(h1, w2_ref[...], preferred_element_type=f32) + b2_ref[...]
    h2 = jnp.maximum(h2, 0.0)                                         # (TB, 128)

    # Output head: zero-padded to 128 lanes so the store is unmasked/lane-dense.
    out = jnp.dot(h2, w3_ref[...], preferred_element_type=f32) + b3_ref[...]
    out_ref[...] = out.astype(out_ref.dtype)                          # (TB, 128); col 0 is real


def pack_params(p):
    """Pack raw params (already [in, out] layout) into the fused kernel form."""
    # Block-diagonal input weight: rows 0..4 -> obs branch (cols 0..63),
    # row 5 -> act branch (cols 64..127).
    w_in = jnp.zeros((IN_DIM, HIDDEN), jnp.float32)
    w_in = w_in.at[:OBS_DIM, :HALF].set(p["wobs"])
    w_in = w_in.at[OBS_DIM:, HALF:].set(p["wact"])
    b_in = jnp.concatenate([p["bobs"], p["bact"]], axis=1)            # (1, 128)

    # Lane-dense output head: real weights/bias in column 0, zeros elsewhere.
    w3p = jnp.zeros((HIDDEN, HIDDEN), jnp.float32).at[:, :1].set(p["w3"])
    b3p = jnp.zeros((1, HIDDEN), jnp.float32).at[:, :1].set(p["b3"])

    return (w_in, b_in, p["w1"], p["b1"], p["w2"], p["b2"], w3p, b3p)


def q_forward(obs, act, params, *, tile_b=DEFAULT_TILE_B):
    """obs: (B, 5) f32, act: (B, 1) f32.  Returns (B, 1) f32."""
    B = obs.shape[0]
    x_in = jnp.concatenate(
        [obs.astype(jnp.float32), act.astype(jnp.float32)], axis=1)   # (B, 6)

    # Batch tile: multiple of 8 sublanes, capped at tile_b; pad B up to a
    # whole number of tiles so every block is full.
    tb = min(tile_b, _round_up(B, 8))
    b_pad = _round_up(B, tb)
    if b_pad != B:
        x_in = jnp.pad(x_in, ((0, b_pad - B), (0, 0)))
    grid = (b_pad // tb,)

    packed = pack_params(params)

    def resident(arr):
        # Weights/biases: full-array block, same block every grid step ->
        # DMA'd once, kept resident in VMEM.
        return pl.BlockSpec(arr.shape, lambda i: (0, 0))

    out = pl.pallas_call(
        _q_kernel,
        out_shape=jax.ShapeDtypeStruct((b_pad, HIDDEN), jnp.float32),
        grid=grid,
        in_specs=[pl.BlockSpec((tb, IN_DIM), lambda i: (i, 0))]
                 + [resident(a) for a in packed],
        out_specs=pl.BlockSpec((tb, HIDDEN), lambda i: (i, 0)),
        compiler_params=pltpu.CompilerParams(
            dimension_semantics=("parallel",)),
    )(x_in, *packed)

    return out[:B, :1]


def init_params(key):
    """Deterministic synthetic params; stored as [in, out] (already transposed)."""
    ks = jax.random.split(key, 10)

    def lin(kw, kb, fan_in, fan_out):
        # PyTorch Linear default init: U(-1/sqrt(fan_in), 1/sqrt(fan_in))
        bound = 1.0 / jnp.sqrt(float(fan_in))
        w = jax.random.uniform(kw, (fan_in, fan_out), jnp.float32, -bound, bound)
        b = jax.random.uniform(kb, (1, fan_out), jnp.float32, -bound, bound)
        return w, b

    wobs, bobs = lin(ks[0], ks[1], OBS_DIM, HALF)
    wact, bact = lin(ks[2], ks[3], ACT_DIM, HALF)
    w1, b1 = lin(ks[4], ks[5], HIDDEN, HIDDEN)
    w2, b2 = lin(ks[6], ks[7], HIDDEN, HIDDEN)
    w3, b3 = lin(ks[8], ks[9], HIDDEN, 1)
    return dict(wobs=wobs, bobs=bobs, wact=wact, bact=bact,
                w1=w1, b1=b1, w2=w2, b2=b2, w3=w3, b3=b3)


def q_forward_ref(obs, act, p):
    """Pure-JAX reference matching the PyTorch forward."""
    xobs = jax.nn.relu(obs @ p["wobs"] + p["bobs"])
    xact = jax.nn.relu(act @ p["wact"] + p["bact"])
    x = jnp.concatenate([xobs, xact], axis=1)
    h1 = jax.nn.relu(x @ p["w1"] + p["b1"])
    h2 = jax.nn.relu(h1 @ p["w2"] + p["b2"])
    return h2 @ p["w3"] + p["b3"]


if __name__ == "__main__":
    key = jax.random.PRNGKey(0)
    kp, ko, ka = jax.random.split(key, 3)

    B = 8
    obs = jax.random.normal(ko, (B, OBS_DIM), jnp.float32)
    act = jax.random.normal(ka, (B, ACT_DIM), jnp.float32)
    params = init_params(kp)

    out = q_forward(obs, act, params)
    out = jax.block_until_ready(out)

    ref = q_forward_ref(obs, act, params)
    assert out.shape == (B, 1)
    assert jnp.allclose(out, ref, atol=1e-4, rtol=1e-4), "mismatch vs reference"

    # Also exercise a multi-tile / padded batch to validate the grid path.
    B2 = 1000
    ko2, ka2 = jax.random.split(ko)
    obs2 = jax.random.normal(ko2, (B2, OBS_DIM), jnp.float32)
    act2 = jax.random.normal(ka2, (B2, ACT_DIM), jnp.float32)
    out2 = jax.block_until_ready(q_forward(obs2, act2, params, tile_b=256))
    ref2 = q_forward_ref(obs2, act2, params)
    assert out2.shape == (B2, 1)
    assert jnp.allclose(out2, ref2, atol=1e-4, rtol=1e-4), "mismatch vs reference (batched)"

    print("KERNEL_OK")
</pallas_src>

<mosaic_0001>
module attributes {stable_mosaic.version = 11 : i64} {
  func.func @_q_kernel(%arg0: i32, %arg1: memref<8x6xf32, #tpu.memory_space<vmem>>, %arg2: memref<6x128xf32, #tpu.memory_space<vmem>>, %arg3: memref<1x128xf32, #tpu.memory_space<vmem>>, %arg4: memref<128x128xf32, #tpu.memory_space<vmem>>, %arg5: memref<1x128xf32, #tpu.memory_space<vmem>>, %arg6: memref<128x128xf32, #tpu.memory_space<vmem>>, %arg7: memref<1x128xf32, #tpu.memory_space<vmem>>, %arg8: memref<128x128xf32, #tpu.memory_space<vmem>>, %arg9: memref<1x128xf32, #tpu.memory_space<vmem>>, %arg10: memref<8x128xf32, #tpu.memory_space<vmem>>) attributes {dimension_semantics = [#tpu.dimension_semantics<parallel>], iteration_bounds = array<i64: 1>, scalar_prefetch = 0 : i64, scratch_operands = 0 : i64, tpu.core_type = #tpu.core_type<tc>, window_params = [{transform_indices = @transform_0, window_bounds = array<i64: 8, 6>}, {pipeline_mode = #tpu.pipeline_mode<synchronous>, transform_indices = @transform_1, window_bounds = array<i64: 6, 128>}, {pipeline_mode = #tpu.pipeline_mode<synchronous>, transform_indices = @transform_2, window_bounds = array<i64: 1, 128>}, {pipeline_mode = #tpu.pipeline_mode<synchronous>, transform_indices = @transform_3, window_bounds = array<i64: 128, 128>}, {pipeline_mode = #tpu.pipeline_mode<synchronous>, transform_indices = @transform_4, window_bounds = array<i64: 1, 128>}, {pipeline_mode = #tpu.pipeline_mode<synchronous>, transform_indices = @transform_5, window_bounds = array<i64: 128, 128>}, {pipeline_mode = #tpu.pipeline_mode<synchronous>, transform_indices = @transform_6, window_bounds = array<i64: 1, 128>}, {pipeline_mode = #tpu.pipeline_mode<synchronous>, transform_indices = @transform_7, window_bounds = array<i64: 128, 128>}, {pipeline_mode = #tpu.pipeline_mode<synchronous>, transform_indices = @transform_8, window_bounds = array<i64: 1, 128>}, {transform_indices = @transform_9, window_bounds = array<i64: 8, 128>}]} {
    %c0 = arith.constant 0 : index
    %c0_0 = arith.constant 0 : index
    %0 = vector.load %arg1[%c0, %c0_0] : memref<8x6xf32, #tpu.memory_space<vmem>>, vector<8x6xf32>
    %c0_1 = arith.constant 0 : index
    %c0_2 = arith.constant 0 : index
    %1 = vector.load %arg2[%c0_1, %c0_2] : memref<6x128xf32, #tpu.memory_space<vmem>>, vector<6x128xf32>
    %cst = arith.constant dense<0.000000e+00> : vector<8x128xf32>
    %2 = tpu.matmul %0, %1, %cst {dimension_numbers = #tpu.dot_dimension_numbers<[1], [0], [0], [1], [0, 0, 1, 1], [], []>} : vector<8x6xf32>, vector<6x128xf32>, vector<8x128xf32> -> vector<8x128xf32>
    %c0_3 = arith.constant 0 : index
    %c0_4 = arith.constant 0 : index
    %3 = vector.load %arg3[%c0_3, %c0_4] : memref<1x128xf32, #tpu.memory_space<vmem>>, vector<1x128xf32>
    %4 = vector.broadcast %3 : vector<1x128xf32> to vector<8x128xf32>
    %5 = arith.addf %2, %4 : vector<8x128xf32>
    %cst_5 = arith.constant 0.000000e+00 : f32
    %6 = vector.broadcast %cst_5 : f32 to vector<8x128xf32>
    %7 = arith.maximumf %5, %6 : vector<8x128xf32>
    %c0_6 = arith.constant 0 : index
    %c0_7 = arith.constant 0 : index
    %8 = vector.load %arg4[%c0_6, %c0_7] : memref<128x128xf32, #tpu.memory_space<vmem>>, vector<128x128xf32>
    %cst_8 = arith.constant dense<0.000000e+00> : vector<8x128xf32>
    %9 = tpu.matmul %7, %8, %cst_8 {dimension_numbers = #tpu.dot_dimension_numbers<[1], [0], [0], [1], [0, 0, 1, 1], [], []>} : vector<8x128xf32>, vector<128x128xf32>, vector<8x128xf32> -> vector<8x128xf32>
    %c0_9 = arith.constant 0 : index
    %c0_10 = arith.constant 0 : index
    %10 = vector.load %arg5[%c0_9, %c0_10] : memref<1x128xf32, #tpu.memory_space<vmem>>, vector<1x128xf32>
    %11 = vector.broadcast %10 : vector<1x128xf32> to vector<8x128xf32>
    %12 = arith.addf %9, %11 : vector<8x128xf32>
    %cst_11 = arith.constant 0.000000e+00 : f32
    %13 = vector.broadcast %cst_11 : f32 to vector<8x128xf32>
    %14 = arith.maximumf %12, %13 : vector<8x128xf32>
    %c0_12 = arith.constant 0 : index
    %c0_13 = arith.constant 0 : index
    %15 = vector.load %arg6[%c0_12, %c0_13] : memref<128x128xf32, #tpu.memory_space<vmem>>, vector<128x128xf32>
    %cst_14 = arith.constant dense<0.000000e+00> : vector<8x128xf32>
    %16 = tpu.matmul %14, %15, %cst_14 {dimension_numbers = #tpu.dot_dimension_numbers<[1], [0], [0], [1], [0, 0, 1, 1], [], []>} : vector<8x128xf32>, vector<128x128xf32>, vector<8x128xf32> -> vector<8x128xf32>
    %c0_15 = arith.constant 0 : index
    %c0_16 = arith.constant 0 : index
    %17 = vector.load %arg7[%c0_15, %c0_16] : memref<1x128xf32, #tpu.memory_space<vmem>>, vector<1x128xf32>
    %18 = vector.broadcast %17 : vector<1x128xf32> to vector<8x128xf32>
    %19 = arith.addf %16, %18 : vector<8x128xf32>
    %cst_17 = arith.constant 0.000000e+00 : f32
    %20 = vector.broadcast %cst_17 : f32 to vector<8x128xf32>
    %21 = arith.maximumf %19, %20 : vector<8x128xf32>
    %c0_18 = arith.constant 0 : index
    %c0_19 = arith.constant 0 : index
    %22 = vector.load %arg8[%c0_18, %c0_19] : memref<128x128xf32, #tpu.memory_space<vmem>>, vector<128x128xf32>
    %cst_20 = arith.constant dense<0.000000e+00> : vector<8x128xf32>
    %23 = tpu.matmul %21, %22, %cst_20 {dimension_numbers = #tpu.dot_dimension_numbers<[1], [0], [0], [1], [0, 0, 1, 1], [], []>} : vector<8x128xf32>, vector<128x128xf32>, vector<8x128xf32> -> vector<8x128xf32>
    %c0_21 = arith.constant 0 : index
    %c0_22 = arith.constant 0 : index
    %24 = vector.load %arg9[%c0_21, %c0_22] : memref<1x128xf32, #tpu.memory_space<vmem>>, vector<1x128xf32>
    %25 = vector.broadcast %24 : vector<1x128xf32> to vector<8x128xf32>
    %26 = arith.addf %23, %25 : vector<8x128xf32>
    %c0_23 = arith.constant 0 : index
    %c0_24 = arith.constant 0 : index
    %27 = vector.load %arg10[%c0_23, %c0_24] : memref<8x128xf32, #tpu.memory_space<vmem>>, vector<8x128xf32>
    tpu.vector_store %arg10[%c0_23, %c0_24], %26 {strides = array<i32>} : memref<8x128xf32, #tpu.memory_space<vmem>>, vector<8x128xf32>,
    return
  }
  func.func @transform_0(%arg0: i32) -> (i32, i32) {
    %c0_i32 = arith.constant 0 : i32
    %c0_i32_0 = arith.constant 0 : i32
    return %arg0, %c0_i32 : i32, i32
  }
  func.func @transform_1(%arg0: i32) -> (i32, i32) {
    %c0_i32 = arith.constant 0 : i32
    %c0_i32_0 = arith.constant 0 : i32
    %c0_i32_1 = arith.constant 0 : i32
    return %c0_i32, %c0_i32_0 : i32, i32
  }
  func.func @transform_2(%arg0: i32) -> (i32, i32) {
    %c0_i32 = arith.constant 0 : i32
    %c0_i32_0 = arith.constant 0 : i32
    %c0_i32_1 = arith.constant 0 : i32
    return %c0_i32, %c0_i32_0 : i32, i32
  }
  func.func @transform_3(%arg0: i32) -> (i32, i32) {
    %c0_i32 = arith.constant 0 : i32
    %c0_i32_0 = arith.constant 0 : i32
    %c0_i32_1 = arith.constant 0 : i32
    return %c0_i32, %c0_i32_0 : i32, i32
  }
  func.func @transform_4(%arg0: i32) -> (i32, i32) {
    %c0_i32 = arith.constant 0 : i32
    %c0_i32_0 = arith.constant 0 : i32
    %c0_i32_1 = arith.constant 0 : i32
    return %c0_i32, %c0_i32_0 : i32, i32
  }
  func.func @transform_5(%arg0: i32) -> (i32, i32) {
    %c0_i32 = arith.constant 0 : i32
    %c0_i32_0 = arith.constant 0 : i32
    %c0_i32_1 = arith.constant 0 : i32
    return %c0_i32, %c0_i32_0 : i32, i32
  }
  func.func @transform_6(%arg0: i32) -> (i32, i32) {
    %c0_i32 = arith.constant 0 : i32
    %c0_i32_0 = arith.constant 0 : i32
    %c0_i32_1 = arith.constant 0 : i32
    return %c0_i32, %c0_i32_0 : i32, i32
  }
  func.func @transform_7(%arg0: i32) -> (i32, i32) {
    %c0_i32 = arith.constant 0 : i32
    %c0_i32_0 = arith.constant 0 : i32
    %c0_i32_1 = arith.constant 0 : i32
    return %c0_i32, %c0_i32_0 : i32, i32
  }
  func.func @transform_8(%arg0: i32) -> (i32, i32) {
    %c0_i32 = arith.constant 0 : i32
    %c0_i32_0 = arith.constant 0 : i32
    %c0_i32_1 = arith.constant 0 : i32
    return %c0_i32, %c0_i32_0 : i32, i32
  }
  func.func @transform_9(%arg0: i32) -> (i32, i32) {
    %c0_i32 = arith.constant 0 : i32
    %c0_i32_0 = arith.constant 0 : i32
    return %arg0, %c0_i32 : i32, i32
  }
}

</mosaic_0001>

<bundles_post_ra>
// kernel: tpu_custom_call.1
= control target key start
LH: loop header
LB: loop body
LE: loop exit
PB: predicated region body
PF: predicated region fallthrough
CT: control target
= control target key end

     0   :  { %14 = vsyncpa [#allocation3], 0  ;;  %s947_s0 = inlined_call_operand.hbm [shape: f32[8,6], index: 0, kind: input, shape index: {}]   ;;  %s948_s1 = inlined_call_operand.hbm [shape: f32[6,128], index: 1, kind: input, shape index: {}]   ;;  %s949_s2 = inlined_call_operand.vmem [shape: f32[1,128], index: 2, kind: input, shape index: {}]   ;;  %s950_s3 = inlined_call_operand.hbm [shape: f32[128,128], index: 3, kind: input, shape index: {}]   ;;  %s951_s4 = inlined_call_operand.vmem [shape: f32[1,128], index: 4, kind: input, shape index: {}]   ;;  %s952_s5 = inlined_call_operand.hbm [shape: f32[128,128], index: 5, kind: input, shape index: {}]   ;;  %s953_s6 = inlined_call_operand.vmem [shape: f32[1,128], index: 6, kind: input, shape index: {}]   ;;  %s954_s7 = inlined_call_operand.hbm [shape: f32[128,128], index: 7, kind: input, shape index: {}]   ;;  %s955_s8 = inlined_call_operand.vmem [shape: f32[1,128], index: 8, kind: input, shape index: {}]   ;;  %s956_s9 = inlined_call_operand.hbm [shape: f32[8,128], index: 9, kind: output, shape index: {}]  }
   0x1   :  { %15 = vsyncpa [#allocation6], 0 }
   0x2   :  { %16 = vsyncpa [#allocation9], 0 }
   0x3   :  { %17 = vsyncpa [#allocation4], 0  ;;  %s791_s30 = smov [#allocation5]  }
   0x4   :  { %s34_s10 = sshll.u32 %s791_s30, 4  ;;  %s35_s10 = int_to_ptr.vmem [resolvable:$true] %s34_s10 }
   0x5   :  { %s671_s11 = scalar_lea.vmem %s35_s10, 128  ;;  %p676_p1 = scmp.lt.s32.totalorder %s35_s10, %s35_s10 }
   0x6   :  { %p672_p0 = scmp.ne.s32.totalorder %s35_s10, %s671_s11  ;;  %p677_p2 = scmp.lt.s32.totalorder %s671_s11, %s671_s11 }
   0x8   :  { %p678_p3 = por %p677_p2, %p676_p1 }
   0xa   :  { %p679_p4 = pnand %p678_p3, %p672_p0 }
   0xc   :  { %682 = shalt.err (!%p679_p4)
}
   0xd   :  { %37 = dma.hbm_to_vmem [thread:$0]  %s948_s1, 128, %s35_s10, [#allocation6]  }
   0xe   :  { %s792_s14 = smov [#allocation8]   ;;  %s793_s16 = smov [#allocation2]  }
   0xf   :  { %s59_s15 = sshll.u32 %s792_s14, 4  ;;  %s24_s17 = sshll.u32 %s793_s16, 4  ;;  %s60_s15 = int_to_ptr.vmem [resolvable:$true] %s59_s15  ;;  %s25_s17 = int_to_ptr.vmem [resolvable:$true] %s24_s17 }
  0x10   :  { %s691_s18 = scalar_lea.vmem %s60_s15, 2048  ;;  %p696_p6 = scmp.lt.s32.totalorder %s60_s15, %s60_s15 }
  0x11   :  { %p692_p5 = scmp.ne.s32.totalorder %s60_s15, %s691_s18  ;;  %p697_p7 = scmp.lt.s32.totalorder %s691_s18, %s691_s18 }
  0x13   :  { %p698_p8 = por %p697_p7, %p696_p6 }
  0x15   :  { %p699_p9 = pnand %p698_p8, %p692_p5 }
  0x17   :  { %702 = shalt.err (!%p699_p9)
}
  0x18   :  { %s794_s19 = smov 128   ;;  %s795_s20 = smov 8  }
  0x19   :  { %65 = dma.hbm_to_vmem [thread:$0]  %s952_s5, 2048, %s60_s15, [#allocation9], %s794_s19, %s794_s19, %s795_s20  }
  0x1a   :  { %s711_s1 = scalar_lea.vmem %s25_s17, 128  ;;  %p716_p11 = scmp.lt.s32.totalorder %s25_s17, %s25_s17 }
  0x1b   :  { %p712_p10 = scmp.ne.s32.totalorder %s25_s17, %s711_s1  ;;  %p717_p12 = scmp.lt.s32.totalorder %s711_s1, %s711_s1 }
  0x1d   :  { %p718_p13 = por %p717_p12, %p716_p11 }
  0x1f   :  { %p719_p0 = pnand %p718_p13, %p712_p10 }
  0x21   :  { %722 = shalt.err (!%p719_p0)
}
  0x22   :  { %27 = dma.hbm_to_vmem [thread:$0]  %s947_s0, 128, %s25_s17, [#allocation3]  }
  0x23   :  { %s796_s25 = smov [#allocation7]   ;;  %s797_s27 = smov [#allocation10]  }
  0x24   :  { %s45_s26 = sshll.u32 %s796_s25, 4  ;;  %s73_s28 = sshll.u32 %s797_s27, 4  ;;  %s46_s26 = int_to_ptr.vmem [resolvable:$true] %s45_s26  ;;  %s74_s28 = int_to_ptr.vmem [resolvable:$true] %s73_s28 }
  0x25   :  { %s731_s29 = scalar_lea.vmem %s46_s26, 2048  ;;  %p736_p2 = scmp.lt.s32.totalorder %s46_s26, %s46_s26 }
  0x26   :  { %p732_p1 = scmp.ne.s32.totalorder %s46_s26, %s731_s29  ;;  %p737_p3 = scmp.lt.s32.totalorder %s731_s29, %s731_s29 }
  0x28   :  { %p738_p4 = por %p737_p3, %p736_p2 }
  0x2a   :  { %p739_p5 = pnand %p738_p4, %p732_p1 }
  0x2c   :  { %742 = shalt.err (!%p739_p5)
}
  0x2d   :  { %51 = dma.hbm_to_vmem [thread:$0]  %s950_s3, 2048, %s46_s26, [#allocation6], %s794_s19, %s794_s19, %s795_s20  }
  0x2e   :  { %s751_s0 = scalar_lea.vmem %s74_s28, 2048  ;;  %p756_p7 = scmp.lt.s32.totalorder %s74_s28, %s74_s28 }
  0x2f   :  { %p752_p6 = scmp.ne.s32.totalorder %s74_s28, %s751_s0  ;;  %p757_p8 = scmp.lt.s32.totalorder %s751_s0, %s751_s0 }
  0x31   :  { %p758_p9 = por %p757_p8, %p756_p7 }
  0x33   :  { %p759_p10 = pnand %p758_p9, %p752_p6 }
  0x35   :  { %762 = shalt.err (!%p759_p10)
}
  0x36   :  { %79 = dma.hbm_to_vmem [thread:$0]  %s954_s7, 2048, %s74_s28, [#allocation9], %s794_s19, %s794_s19, %s795_s20  }
  0x37   :  { %783 = dma.done.wait [#allocation3], 128  }
  0x38   :  { %784 = vsyncadd [#allocation3], 4294967168 }
  0x39   :  { %785 = dma.done.wait [#allocation6], 2176  }
  0x3a   :  { %786 = vsyncadd [#allocation6], 4294965120 }
  0x3b   :  { %787 = dma.done.wait [#allocation9], 4096  }
  0x3c   :  { %788 = vsyncadd [#allocation9], 4294963200  ;;  %v798_v0 = vmov 0.0   ;;  %vm799_vm0 = vmmov 0   ;;  %vm110_vm1 = vcmask 1045504   ;;  %vm106_vm2 = vcmask 48128  }
  0x3d   :  { %543 = vmatprep.subr.mxu0 %v798_v0  ;;  %545 = vmatprep.mubr.msk.f32.mxu0 %vm799_vm0, %v798_v0  ;;  %v98_v1 = vld [vmem:[#allocation5] sm:$0x3f]  ;;  %v97_v2 = vld [vmem:[#allocation2] sm:$0xff]  ;;  %v198_v5 = vld [vmem:[#allocation7 + $0x68] sm:$0xff]  ;;  %s800_s16 = smov [#allocation11]  }
  0x3e   :  { %548 = vmatprep.subr.mxu1 %v798_v0  ;;  %580 = vmatprep.mubr.msk.f32.mxu1 %vm799_vm0, %v798_v0  ;;  %v200_v3 = vld [vmem:[#allocation7 + $0x78] sm:$0xff]  ;;  %v199_v4 = vld [vmem:[#allocation7 + $0x70] sm:$0xff]  ;;  %v197_v6 = vld [vmem:[#allocation7 + $0x60] sm:$0xff]  ;;  %s473_s17 = sshll.u32 %s800_s16, 4  ;;  %s474_s17 = int_to_ptr.vmem [resolvable:$true] %s473_s17 }
  0x3f   :  { %544 = vmatpush3.msk.msra.mxu0 %vm110_vm1, %v98_v1  ;;  %549 = vmatpush3.msra.mxu1 %v200_v3  ;;  %v196_v7 = vld [vmem:[#allocation7 + $0x58] sm:$0xff]  ;;  %v195_v8 = vld [vmem:[#allocation7 + $0x50] sm:$0xff]  ;;  %v194_v9 = vld [vmem:[#allocation7 + $0x48] sm:$0xff]  ;;  %s763_s18 = scalar_lea.vmem %s474_s17, 128  ;;  %p768_p12 = scmp.lt.s32.totalorder %s474_s17, %s474_s17 }
  0x40   :  { %546 = vmatmul.mubr.msk.f32.vlgmr.msra.gmra.mxu0 %vm106_vm2, %v97_v2  ;;  %550 = vmatprep.subr.mxu1 %v798_v0  ;;  %v193_v10 = vld [vmem:[#allocation7 + $0x40] sm:$0xff]  ;;  %v192_v11 = vld [vmem:[#allocation7 + $0x38] sm:$0xff]  ;;  %v191_v12 = vld [vmem:[#allocation7 + $0x30] sm:$0xff]  ;;  %p764_p11 = scmp.ne.s32.totalorder %s474_s17, %s763_s18  ;;  %p769_p13 = scmp.lt.s32.totalorder %s763_s18, %s763_s18 }
  0x41   :  { %551 = vmatpush3.msra.mxu1 %v199_v4  ;;  %583 = vmatprep.subr.mxu0 %v798_v0  ;;  %v190_v13 = vld [vmem:[#allocation7 + $0x28] sm:$0xff]  ;;  %v189_v14 = vld [vmem:[#allocation7 + $0x20] sm:$0xff]  ;;  %v188_v15 = vld [vmem:[#allocation7 + $0x18] sm:$0xff] }
  0x42   :  { %552 = vmatprep.subr.mxu1 %v798_v0  ;;  %615 = vmatprep.mubr.msk.f32.mxu0 %vm799_vm0, %v798_v0  ;;  %v187_v16 = vld [vmem:[#allocation7 + $0x10] sm:$0xff]  ;;  %v186_v17 = vld [vmem:[#allocation7 + $0x8] sm:$0xff]  ;;  %v185_v18 = vld [vmem:[#allocation7] sm:$0xff]  ;;  %p770_p0 = por %p769_p13, %p768_p12 }
  0x43   :  { %553 = vmatpush3.msra.mxu1 %v198_v5  ;;  %v294_v19 = vld [vmem:[#allocation8 + $0x78] sm:$0xff]  ;;  %v293_v20 = vld [vmem:[#allocation8 + $0x70] sm:$0xff]  ;;  %v292_v21 = vld [vmem:[#allocation8 + $0x68] sm:$0xff] }
  0x44   :  { %554 = vmatprep.subr.mxu1 %v798_v0  ;;  %584 = vmatpush3.msra.mxu0 %v294_v19  ;;  %v291_v22 = vld [vmem:[#allocation8 + $0x60] sm:$0xff]  ;;  %v290_v23 = vld [vmem:[#allocation8 + $0x58] sm:$0xff]  ;;  %v289_v24 = vld [vmem:[#allocation8 + $0x50] sm:$0xff]  ;;  %p771_p1 = pnand %p770_p0, %p764_p11 }
  0x45   :  { %555 = vmatpush3.msra.mxu1 %v197_v6  ;;  %585 = vmatprep.subr.mxu0 %v798_v0  ;;  %v288_v25 = vld [vmem:[#allocation8 + $0x48] sm:$0xff]  ;;  %v287_v26 = vld [vmem:[#allocation8 + $0x40] sm:$0xff]  ;;  %v286_v27 = vld [vmem:[#allocation8 + $0x38] sm:$0xff] }
  0x46   :  { %556 = vmatprep.subr.mxu1 %v798_v0  ;;  %586 = vmatpush3.msra.mxu0 %v293_v20  ;;  %v285_v28 = vld [vmem:[#allocation8 + $0x30] sm:$0xff]  ;;  %v284_v29 = vld [vmem:[#allocation8 + $0x28] sm:$0xff]  ;;  %v283_v30 = vld [vmem:[#allocation8 + $0x20] sm:$0xff] }
  0x47   :  { %557 = vmatpush3.msra.mxu1 %v196_v7  ;;  %587 = vmatprep.subr.mxu0 %v798_v0  ;;  %v282_v31 = vld [vmem:[#allocation8 + $0x18] sm:$0xff]  ;;  %v484_v32 = vld [vmem:[%s949_s2] ss:$0 sm:$0xff]  ;;  %v280_v38 = vld [vmem:[#allocation8 + $0x8] sm:$0xff] }
  0x48   :  { %558 = vmatprep.subr.mxu1 %v798_v0  ;;  %588 = vmatpush3.msra.mxu0 %v292_v21  ;;  %v281_v37 = vld [vmem:[#allocation8 + $0x10] sm:$0xff]  ;;  %v279_v39 = vld [vmem:[#allocation8] sm:$0xff]  ;;  %v388_v40 = vld [vmem:[#allocation10 + $0x78] sm:$0xff] }
  0x49   :  { %559 = vmatpush3.msra.mxu1 %v195_v8  ;;  %589 = vmatprep.subr.mxu0 %v798_v0  ;;  %v387_v41 = vld [vmem:[#allocation10 + $0x70] sm:$0xff]  ;;  %v386_v42 = vld [vmem:[#allocation10 + $0x68] sm:$0xff]  ;;  %v385_v43 = vld [vmem:[#allocation10 + $0x60] sm:$0xff] }
  0x4a   :  { %560 = vmatprep.subr.mxu1 %v798_v0  ;;  %590 = vmatpush3.msra.mxu0 %v291_v22  ;;  %v384_v44 = vld [vmem:[#allocation10 + $0x58] sm:$0xff]  ;;  %v383_v45 = vld [vmem:[#allocation10 + $0x50] sm:$0xff]  ;;  %v382_v46 = vld [vmem:[#allocation10 + $0x48] sm:$0xff] }
  0x4b   :  { %561 = vmatpush3.msra.mxu1 %v194_v9  ;;  %591 = vmatprep.subr.mxu0 %v798_v0  ;;  %v381_v47 = vld [vmem:[#allocation10 + $0x40] sm:$0xff]  ;;  %v380_v48 = vld [vmem:[#allocation10 + $0x38] sm:$0xff]  ;;  %v379_v49 = vld [vmem:[#allocation10 + $0x30] sm:$0xff] }
  0x4c   :  { %562 = vmatprep.subr.mxu1 %v798_v0  ;;  %592 = vmatpush3.msra.mxu0 %v290_v23  ;;  %v378_v50 = vld [vmem:[#allocation10 + $0x28] sm:$0xff]  ;;  %v377_v51 = vld [vmem:[#allocation10 + $0x20] sm:$0xff]  ;;  %v376_v52 = vld [vmem:[#allocation10 + $0x18] sm:$0xff] }
  0x4d   :  { %563 = vmatpush3.msra.mxu1 %v193_v10  ;;  %593 = vmatprep.subr.mxu0 %v798_v0  ;;  %v487_v53 = vld [vmem:[%s951_s4] ss:$0 sm:$0xff]  ;;  %v374_v59 = vld [vmem:[#allocation10 + $0x8] sm:$0xff]  ;;  %v373_v60 = vld [vmem:[#allocation10] sm:$0xff] }
  0x4e   :  { %564 = vmatprep.subr.mxu1 %v798_v0  ;;  %594 = vmatpush3.msra.mxu0 %v289_v24  ;;  %v375_v58 = vld [vmem:[#allocation10 + $0x10] sm:$0xff] }
  0x4f   :  { %565 = vmatpush3.msra.mxu1 %v192_v11  ;;  %595 = vmatprep.subr.mxu0 %v798_v0  ;;  %v488_v61 = vld [vmem:[%s953_s6] ss:$0 sm:$0xff] }
  0x50   :  { %566 = vmatprep.subr.mxu1 %v798_v0  ;;  %596 = vmatpush3.msra.mxu0 %v288_v25  ;;  %v489_v3 = vld [vmem:[%s955_s8] ss:$0 sm:$0xff] }
  0x51   :  { %567 = vmatpush3.msra.mxu1 %v191_v12  ;;  %597 = vmatprep.subr.mxu0 %v798_v0 }
  0x52   :  { %568 = vmatprep.subr.mxu1 %v798_v0  ;;  %598 = vmatpush3.msra.mxu0 %v287_v26 }
  0x53   :  { %569 = vmatpush3.msra.mxu1 %v190_v13  ;;  %599 = vmatprep.subr.mxu0 %v798_v0 }
  0x54   :  { %570 = vmatprep.subr.mxu1 %v798_v0  ;;  %600 = vmatpush3.msra.mxu0 %v286_v27 }
  0x55   :  { %571 = vmatpush3.msra.mxu1 %v189_v14  ;;  %601 = vmatprep.subr.mxu0 %v798_v0 }
  0x56   :  { %572 = vmatprep.subr.mxu1 %v798_v0  ;;  %602 = vmatpush3.msra.mxu0 %v285_v28 }
  0x57   :  { %573 = vmatpush3.msra.mxu1 %v188_v15  ;;  %603 = vmatprep.subr.mxu0 %v798_v0 }
  0x58   :  { %574 = vmatprep.subr.mxu1 %v798_v0  ;;  %604 = vmatpush3.msra.mxu0 %v284_v29 }
  0x59   :  { %575 = vmatpush3.msra.mxu1 %v187_v16  ;;  %605 = vmatprep.subr.mxu0 %v798_v0 }
  0x5a   :  { %576 = vmatprep.subr.mxu1 %v798_v0  ;;  %606 = vmatpush3.msra.mxu0 %v283_v30 }
  0x5b   :  { %577 = vmatpush3.msra.mxu1 %v186_v17  ;;  %607 = vmatprep.subr.mxu0 %v798_v0 }
  0x5c   :  { %578 = vmatprep.subr.mxu1 %v798_v0  ;;  %608 = vmatpush3.msra.mxu0 %v282_v31 }
  0x5d   :  { %579 = vmatpush3.msra.mxu1 %v185_v18  ;;  %609 = vmatprep.subr.mxu0 %v798_v0 }
  0x5e   :  { %618 = vmatprep.subr.mxu1 %v798_v0  ;;  %610 = vmatpush3.msra.mxu0 %v281_v37 }
  0x5f   :  { %611 = vmatprep.subr.mxu0 %v798_v0 }
  0x60   :  { %612 = vmatpush3.msra.mxu0 %v280_v38 }
  0x61   :  { %613 = vmatprep.subr.mxu0 %v798_v0 }
  0x62   :  { %614 = vmatpush3.msra.mxu0 %v279_v39 }
 0x100   :  { %v180_v33 = vpop.f32.mrf.mxu0 }
 0x101   :  { %v181_v34 = vadd.f32 %v484_v32, %v180_v33 }
 0x102   :  { %v547_v35 = vpop.f32.mrf.mxu0 }
 0x103   :  { %v184_v36 = vmax.f32 %v181_v34, 0.0 }
 0x105   :  { %581 = vmatmul.mubr.f32.vlgmr.msra.gmra.mxu1 %v184_v36 }
 0x106   :  { %650 = vmatprep.mubr.msk.f32.mxu1 %vm799_vm0, %v798_v0  ;;  %619 = vmatpush3.msra.mxu1 %v388_v40 }
 0x107   :  { %620 = vmatprep.subr.mxu1 %v798_v0 }
 0x108   :  { %621 = vmatpush3.msra.mxu1 %v387_v41 }
 0x109   :  { %622 = vmatprep.subr.mxu1 %v798_v0 }
 0x10a   :  { %623 = vmatpush3.msra.mxu1 %v386_v42 }
 0x10b   :  { %624 = vmatprep.subr.mxu1 %v798_v0 }
 0x10c   :  { %625 = vmatpush3.msra.mxu1 %v385_v43 }
 0x10d   :  { %626 = vmatprep.subr.mxu1 %v798_v0 }
 0x10e   :  { %627 = vmatpush3.msra.mxu1 %v384_v44 }
 0x10f   :  { %628 = vmatprep.subr.mxu1 %v798_v0 }
 0x110   :  { %629 = vmatpush3.msra.mxu1 %v383_v45 }
 0x111   :  { %630 = vmatprep.subr.mxu1 %v798_v0 }
 0x112   :  { %631 = vmatpush3.msra.mxu1 %v382_v46 }
 0x113   :  { %632 = vmatprep.subr.mxu1 %v798_v0 }
 0x114   :  { %633 = vmatpush3.msra.mxu1 %v381_v47 }
 0x115   :  { %634 = vmatprep.subr.mxu1 %v798_v0 }
 0x116   :  { %635 = vmatpush3.msra.mxu1 %v380_v48 }
 0x117   :  { %636 = vmatprep.subr.mxu1 %v798_v0 }
 0x118   :  { %637 = vmatpush3.msra.mxu1 %v379_v49 }
 0x119   :  { %638 = vmatprep.subr.mxu1 %v798_v0 }
 0x11a   :  { %639 = vmatpush3.msra.mxu1 %v378_v50 }
 0x11b   :  { %640 = vmatprep.subr.mxu1 %v798_v0 }
 0x11c   :  { %641 = vmatpush3.msra.mxu1 %v377_v51 }
 0x11d   :  { %642 = vmatprep.subr.mxu1 %v798_v0 }
 0x11e   :  { %643 = vmatpush3.msra.mxu1 %v376_v52 }
 0x11f   :  { %644 = vmatprep.subr.mxu1 %v798_v0 }
 0x120   :  { %645 = vmatpush3.msra.mxu1 %v375_v58 }
 0x121   :  { %646 = vmatprep.subr.mxu1 %v798_v0 }
 0x122   :  { %647 = vmatpush3.msra.mxu1 %v374_v59 }
 0x123   :  { %648 = vmatprep.subr.mxu1 %v798_v0 }
 0x124   :  { %649 = vmatpush3.msra.mxu1 %v373_v60 }
 0x1c5   :  { %v274_v54 = vpop.f32.mrf.mxu1 }
 0x1c6   :  { %v275_v55 = vadd.f32 %v487_v53, %v274_v54 }
 0x1c7   :  { %v582_v56 = vpop.f32.mrf.mxu1 }
 0x1c8   :  { %v278_v57 = vmax.f32 %v275_v55, 0.0 }
 0x1ca   :  { %616 = vmatmul.mubr.f32.vlgmr.msra.gmra.mxu0 %v278_v57 }
 0x28a   :  { %v368_v62 = vpop.f32.mrf.mxu0 }
 0x28b   :  { %v369_v63 = vadd.f32 %v488_v61, %v368_v62 }
 0x28c   :  { %v617_v1 = vpop.f32.mrf.mxu0 }
 0x28d   :  { %v372_v2 = vmax.f32 %v369_v63, 0.0 }
 0x28f   :  { %651 = vmatmul.mubr.f32.vlgmr.msra.gmra.mxu1 %v372_v2 }
 0x34f   :  { %v462_v4 = vpop.f32.mrf.mxu1 }
 0x350   :  { %v463_v5 = vadd.f32 %v489_v3, %v462_v4 }
 0x351   :  { %v652_v0 = vpop.f32.mrf.mxu1 }
 0x352   :  { %466 = vst [vmem:[#allocation11] sm:$0xff] %v463_v5 }
 0x353   :  { %774 = shalt.err (!%p771_p1)
}
 0x354   :  { %476 = dma.vmem_to_hbm [thread:$0]  %s474_s17, 128, %s956_s9, [#allocation4]  }
 0x355   :  { %789 = dma.done.wait [#allocation4], 128  }
 0x356   :  { %790 = vsyncadd [#allocation4], 4294967168 }
 0x357   :  { %480 = vsyncpa [#allocation3], 1 }
 0x358   :  { %481 = vsyncpa [#allocation6], 1 }
 0x359   :  { %482 = vsyncpa [#allocation9], 1 }
 0x35a   :  { %483 = vsyncpa [#allocation4], 1 }

</bundles_post_ra>
